<compile_context>
chip_gen: v7x
topology: tpu7x:2x2x1
jax: 0.10.0
libtpu: 0.0.40
codegen_flags: <defaults>
</compile_context>

<pallas_src>
import functools

import jax
import jax.numpy as jnp
from jax.experimental import pallas as pl
from jax.experimental.pallas import tpu as pltpu


def _round_up(n, m):
    return ((n + m - 1) // m) * m


def sublayer_connection_kernel(x_ref, a2_ref, b2_ref, w_ref, bias_ref, o_ref, *, eps, feat):
    """One row tile: LayerNorm (f32) -> Linear (bf16 MXU, f32 acc) -> residual add."""
    xf = x_ref[...].astype(jnp.float32)                         # [TR, D] single f32 temp

    # --- LayerNorm, PyTorch semantics: unbiased std (N-1), eps added to the std ---
    mean = jnp.mean(xf, axis=-1, keepdims=True)                 # [TR, 1]
    d = xf - mean
    var = jnp.sum(d * d, axis=-1, keepdims=True) * (1.0 / (feat - 1))
    inv = pl.reciprocal(jnp.sqrt(var) + eps, approx=False)      # [TR, 1], one recip per row
    y = (d * inv) * a2_ref[...] + b2_ref[...]                   # [TR, D]

    # --- synthetic sublayer: Linear(D -> D); bf16 operands, f32 accumulation on MXU ---
    h = jnp.dot(y.astype(jnp.bfloat16), w_ref[...],
                preferred_element_type=jnp.float32) + bias_ref[...]

    # --- dropout (identity at inference) + residual; single downcast, single store ---
    o_ref[...] = (xf + h).astype(o_ref.dtype)


def sublayer_connection(x, a2, b2, w, bias, *, eps=1e-6, row_tile=256):
    """x: [rows, hidden]; a2, b2, bias: [hidden]; w: [hidden, hidden]."""
    rows, feat = x.shape
    out_dtype = x.dtype
    itemsize = jnp.dtype(x.dtype).itemsize

    # Row tile: multiple of sublane packing (8 for f32, 16 for bf16), capped by rows.
    sub = {4: 8, 2: 16, 1: 32}[itemsize]
    tr = min(_round_up(row_tile, sub), _round_up(rows, sub))

    # Weights resident in VMEM in bf16 (f32 accumulate on the MXU).
    w_bf16 = w.astype(jnp.bfloat16)

    # VMEM budget: double-buffered x/out tiles + resident weights/params.
    def _vmem_estimate(tile_rows):
        x_tile = tile_rows * feat * itemsize
        o_tile = tile_rows * feat * jnp.dtype(out_dtype).itemsize
        resident = feat * feat * 2 + 3 * feat * 4            # bf16 W + f32 a2/b2/bias
        return 2 * x_tile + 2 * o_tile + 2 * resident

    budget = 48 * 1024 * 1024                 # headroom inside v7x's 64 MiB VMEM per TC
    while _vmem_estimate(tr) > budget and tr > sub:
        tr = max(sub, tr // 2)
    vmem_limit = min(max(int(_vmem_estimate(tr) * 1.5), 8 * 1024 * 1024), 64 * 1024 * 1024)

    # Pad rows to a multiple of the tile; padded rows are sliced off after the call.
    padded_rows = _round_up(rows, tr)
    if padded_rows != rows:
        x = jnp.pad(x, ((0, padded_rows - rows), (0, 0)))

    a2 = a2.reshape(1, feat).astype(jnp.float32)
    b2 = b2.reshape(1, feat).astype(jnp.float32)
    bias = bias.reshape(1, feat).astype(jnp.float32)

    kernel = functools.partial(sublayer_connection_kernel, eps=eps, feat=feat)

    out = pl.pallas_call(
        kernel,
        out_shape=jax.ShapeDtypeStruct((padded_rows, feat), out_dtype),
        grid_spec=pltpu.PrefetchScalarGridSpec(
            num_scalar_prefetch=0,
            grid=(padded_rows // tr,),
            in_specs=[
                pl.BlockSpec((tr, feat), lambda i: (i, 0)),     # x: row-tiled, pipelined
                pl.BlockSpec((1, feat), lambda i: (0, 0)),      # a_2: VMEM-resident
                pl.BlockSpec((1, feat), lambda i: (0, 0)),      # b_2: VMEM-resident
                pl.BlockSpec((feat, feat), lambda i: (0, 0)),   # W (bf16): VMEM-resident
                pl.BlockSpec((1, feat), lambda i: (0, 0)),      # bias: VMEM-resident
            ],
            out_specs=pl.BlockSpec((tr, feat), lambda i: (i, 0)),
        ),
        # Output tile mapping == x tile mapping (same shape/dtype): alias, no extra HBM alloc.
        input_output_aliases={0: 0},
        compiler_params=pltpu.CompilerParams(
            dimension_semantics=("parallel",),   # independent row tiles -> both TCs on v7x
            vmem_limit_bytes=vmem_limit,
        ),
    )(x, a2, b2, w_bf16, bias)

    return out[:rows] if padded_rows != rows else out


def reference(x, a2, b2, w_bf16, bias, eps=1e-6):
    """Pure-JAX reference mirroring the kernel's bf16-operand / f32-accumulate matmul."""
    xf = x.astype(jnp.float32)
    mean = jnp.mean(xf, axis=-1, keepdims=True)
    d = xf - mean
    var = jnp.sum(d * d, axis=-1, keepdims=True) / (x.shape[-1] - 1)
    std = jnp.sqrt(var)
    y = a2 * d / (std + eps) + b2
    h = jnp.dot(y.astype(jnp.bfloat16), w_bf16, preferred_element_type=jnp.float32) + bias
    return (xf + h).astype(x.dtype)


if __name__ == "__main__":
    batch, seq, hidden = 2, 8, 32
    key = jax.random.PRNGKey(0)
    kx, kw, kb = jax.random.split(key, 3)

    x = jax.random.normal(kx, (batch, seq, hidden), dtype=jnp.float32)

    # LayerNorm params as in __init__: a_2 = ones, b_2 = zeros
    a2 = jnp.ones((hidden,), jnp.float32)
    b2 = jnp.zeros((hidden,), jnp.float32)

    # deterministic synthetic sublayer (Linear hidden -> hidden)
    w = jax.random.normal(kw, (hidden, hidden), dtype=jnp.float32) * 0.05
    bias = jax.random.normal(kb, (hidden,), dtype=jnp.float32) * 0.01

    x2d = x.reshape(batch * seq, hidden)

    ref = reference(x2d, a2.reshape(1, -1), b2.reshape(1, -1),
                    w.astype(jnp.bfloat16), bias.reshape(1, -1))
    ref = ref.reshape(batch, seq, hidden)

    out = sublayer_connection(x2d, a2, b2, w, bias)
    out = jax.block_until_ready(out)
    out = out.reshape(batch, seq, hidden)

    assert out.shape == (batch, seq, hidden)
    assert jnp.allclose(out, ref, atol=1e-3, rtol=1e-3), float(jnp.max(jnp.abs(out - ref)))

    print("KERNEL_OK")
</pallas_src>

<mosaic_0001>
module attributes {stable_mosaic.version = 11 : i64} {
  func.func @sublayer_connection_kernel(%arg0: i32, %arg1: memref<16x32xf32, #tpu.memory_space<vmem>>, %arg2: memref<1x32xf32, #tpu.memory_space<vmem>>, %arg3: memref<1x32xf32, #tpu.memory_space<vmem>>, %arg4: memref<32x32xbf16, #tpu.memory_space<vmem>>, %arg5: memref<1x32xf32, #tpu.memory_space<vmem>>, %arg6: memref<16x32xf32, #tpu.memory_space<vmem>>) attributes {dimension_semantics = [#tpu.dimension_semantics<parallel>], iteration_bounds = array<i64: 1>, scalar_prefetch = 0 : i64, scratch_operands = 0 : i64, tpu.core_type = #tpu.core_type<tc>, window_params = [{transform_indices = @transform_0, window_bounds = array<i64: 16, 32>}, {pipeline_mode = #tpu.pipeline_mode<synchronous>, transform_indices = @transform_1, window_bounds = array<i64: 1, 32>}, {pipeline_mode = #tpu.pipeline_mode<synchronous>, transform_indices = @transform_2, window_bounds = array<i64: 1, 32>}, {pipeline_mode = #tpu.pipeline_mode<synchronous>, transform_indices = @transform_3, window_bounds = array<i64: 32, 32>}, {pipeline_mode = #tpu.pipeline_mode<synchronous>, transform_indices = @transform_4, window_bounds = array<i64: 1, 32>}, {transform_indices = @transform_5, window_bounds = array<i64: 16, 32>}]} {
    %c0 = arith.constant 0 : index
    %c0_0 = arith.constant 0 : index
    %0 = vector.load %arg1[%c0, %c0_0] : memref<16x32xf32, #tpu.memory_space<vmem>>, vector<16x32xf32>
    %cst = arith.constant dense<0.000000e+00> : vector<16xf32>
    %1 = vector.multi_reduction <add>, %0, %cst [1] : vector<16x32xf32> to vector<16xf32>
    %2 = vector.shape_cast %1 : vector<16xf32> to vector<16x1xf32>
    %cst_1 = arith.constant 3.200000e+01 : f32
    %3 = vector.broadcast %cst_1 : f32 to vector<16x1xf32>
    %4 = arith.divf %2, %3 : vector<16x1xf32>
    %5 = vector.broadcast %4 : vector<16x1xf32> to vector<16x32xf32>
    %6 = arith.subf %0, %5 : vector<16x32xf32>
    %7 = arith.mulf %6, %6 : vector<16x32xf32>
    %cst_2 = arith.constant dense<0.000000e+00> : vector<16xf32>
    %8 = vector.multi_reduction <add>, %7, %cst_2 [1] : vector<16x32xf32> to vector<16xf32>
    %9 = vector.shape_cast %8 : vector<16xf32> to vector<16x1xf32>
    %cst_3 = arith.constant 0.0322580636 : f32
    %10 = vector.broadcast %cst_3 : f32 to vector<16x1xf32>
    %11 = arith.mulf %9, %10 : vector<16x1xf32>
    %12 = math.sqrt %11 : vector<16x1xf32>
    %cst_4 = arith.constant 9.99999997E-7 : f32
    %13 = vector.broadcast %cst_4 : f32 to vector<16x1xf32>
    %14 = arith.addf %12, %13 : vector<16x1xf32>
    %15 = tpu.reciprocal %14 : vector<16x1xf32> -> vector<16x1xf32>
    %16 = vector.broadcast %15 : vector<16x1xf32> to vector<16x32xf32>
    %17 = arith.mulf %6, %16 : vector<16x32xf32>
    %c0_5 = arith.constant 0 : index
    %c0_6 = arith.constant 0 : index
    %18 = vector.load %arg2[%c0_5, %c0_6] : memref<1x32xf32, #tpu.memory_space<vmem>>, vector<1x32xf32>
    %19 = vector.broadcast %18 : vector<1x32xf32> to vector<16x32xf32>
    %20 = arith.mulf %17, %19 : vector<16x32xf32>
    %c0_7 = arith.constant 0 : index
    %c0_8 = arith.constant 0 : index
    %21 = vector.load %arg3[%c0_7, %c0_8] : memref<1x32xf32, #tpu.memory_space<vmem>>, vector<1x32xf32>
    %22 = vector.broadcast %21 : vector<1x32xf32> to vector<16x32xf32>
    %23 = arith.addf %20, %22 : vector<16x32xf32>
    %24 = arith.truncf %23 : vector<16x32xf32> to vector<16x32xbf16>
    %c0_9 = arith.constant 0 : index
    %c0_10 = arith.constant 0 : index
    %25 = vector.load %arg4[%c0_9, %c0_10] : memref<32x32xbf16, #tpu.memory_space<vmem>>, vector<32x32xbf16>
    %cst_11 = arith.constant dense<0.000000e+00> : vector<16x32xf32>
    %26 = tpu.matmul %24, %25, %cst_11 {dimension_numbers = #tpu.dot_dimension_numbers<[1], [0], [0], [1], [0, 0, 1, 1], [], []>} : vector<16x32xbf16>, vector<32x32xbf16>, vector<16x32xf32> -> vector<16x32xf32>
    %c0_12 = arith.constant 0 : index
    %c0_13 = arith.constant 0 : index
    %27 = vector.load %arg5[%c0_12, %c0_13] : memref<1x32xf32, #tpu.memory_space<vmem>>, vector<1x32xf32>
    %28 = vector.broadcast %27 : vector<1x32xf32> to vector<16x32xf32>
    %29 = arith.addf %26, %28 : vector<16x32xf32>
    %30 = arith.addf %0, %29 : vector<16x32xf32>
    %c0_14 = arith.constant 0 : index
    %c0_15 = arith.constant 0 : index
    %31 = vector.load %arg6[%c0_14, %c0_15] : memref<16x32xf32, #tpu.memory_space<vmem>>, vector<16x32xf32>
    tpu.vector_store %arg6[%c0_14, %c0_15], %30 {strides = array<i32>} : memref<16x32xf32, #tpu.memory_space<vmem>>, vector<16x32xf32>,
    return
  }
  func.func @transform_0(%arg0: i32) -> (i32, i32) {
    %c0_i32 = arith.constant 0 : i32
    %c0_i32_0 = arith.constant 0 : i32
    return %arg0, %c0_i32 : i32, i32
  }
  func.func @transform_1(%arg0: i32) -> (i32, i32) {
    %c0_i32 = arith.constant 0 : i32
    %c0_i32_0 = arith.constant 0 : i32
    %c0_i32_1 = arith.constant 0 : i32
    return %c0_i32, %c0_i32_0 : i32, i32
  }
  func.func @transform_2(%arg0: i32) -> (i32, i32) {
    %c0_i32 = arith.constant 0 : i32
    %c0_i32_0 = arith.constant 0 : i32
    %c0_i32_1 = arith.constant 0 : i32
    return %c0_i32, %c0_i32_0 : i32, i32
  }
  func.func @transform_3(%arg0: i32) -> (i32, i32) {
    %c0_i32 = arith.constant 0 : i32
    %c0_i32_0 = arith.constant 0 : i32
    %c0_i32_1 = arith.constant 0 : i32
    return %c0_i32, %c0_i32_0 : i32, i32
  }
  func.func @transform_4(%arg0: i32) -> (i32, i32) {
    %c0_i32 = arith.constant 0 : i32
    %c0_i32_0 = arith.constant 0 : i32
    %c0_i32_1 = arith.constant 0 : i32
    return %c0_i32, %c0_i32_0 : i32, i32
  }
  func.func @transform_5(%arg0: i32) -> (i32, i32) {
    %c0_i32 = arith.constant 0 : i32
    %c0_i32_0 = arith.constant 0 : i32
    return %arg0, %c0_i32 : i32, i32
  }
}

</mosaic_0001>

<bundles_post_ra>
// kernel: tpu_custom_call.1
= control target key start
LH: loop header
LB: loop body
LE: loop exit
PB: predicated region body
PF: predicated region fallthrough
CT: control target
= control target key end

     0   :  { %10 = vsyncpa [#allocation3], 0  ;;  %s366_s0 = inlined_call_operand.hbm [shape: f32[16,32], index: 0, kind: input, shape index: {}, may-alias: {0,5}]   ;;  %s367_s1 = inlined_call_operand.vmem [shape: f32[1,32], index: 1, kind: input, shape index: {}]   ;;  %s368_s2 = inlined_call_operand.vmem [shape: f32[1,32], index: 2, kind: input, shape index: {}]   ;;  %s369_s3 = inlined_call_operand.vmem [shape: bf16[32,32], index: 3, kind: input, shape index: {}]   ;;  %s370_s4 = inlined_call_operand.vmem [shape: f32[1,32], index: 4, kind: input, shape index: {}]   ;;  %s371_s5 = inlined_call_operand.hbm [shape: f32[16,32], index: 5, kind: output, shape index: {}, may-alias: {0,5}]  }
   0x1   :  { %11 = vsyncpa [#allocation4], 0  ;;  %s268_s18 = smov [#allocation2]   ;;  %s220_s22 = scalar_lea.hbm %s366_s0, 256 }
   0x2   :  { %s17_s19 = sshll.u32 %s268_s18, 4  ;;  %p221_p0 = scmp.ne.s32.totalorder %s366_s0, %s220_s22  ;;  %s18_s19 = int_to_ptr.vmem [resolvable:$true] %s17_s19 }
   0x3   :  { %p224_p1 = scmp.lt.u32.totalorder %s220_s22, %s366_s0 }
   0x5   :  { %p226_p2 = pnand %p224_p1, %p221_p0 }
   0x7   :  { %229 = shalt.err (!%p226_p2)
}
   0x8   :  { %s230_s27 = scalar_lea.vmem %s18_s19, 256  ;;  %p235_p4 = scmp.lt.s32.totalorder %s18_s19, %s18_s19 }
   0x9   :  { %p231_p3 = scmp.ne.s32.totalorder %s18_s19, %s230_s27  ;;  %p236_p5 = scmp.lt.s32.totalorder %s230_s27, %s230_s27 }
   0xb   :  { %p237_p6 = por %p236_p5, %p235_p4 }
   0xd   :  { %p238_p7 = pnand %p237_p6, %p231_p3 }
   0xf   :  { %241 = shalt.err (!%p238_p7)
}
  0x10   :  { %s269_s28 = smov 128   ;;  %s270_s29 = smov 8  }
  0x11   :  { %23 = dma.hbm_to_vmem [thread:$0]  %s366_s0, 256, %s18_s19, [#allocation3], %s269_s28, %s269_s28, %s270_s29  }
  0x12   :  { %264 = dma.done.wait [#allocation3], 256  }
  0x13   :  { %265 = vsyncadd [#allocation3], 4294967040  ;;  %vm38_vm0 = vcmask 261120   ;;  %v319_v0 = vld [vmem:[#allocation2] sm:$0xff]  ;;  %v321_v1 = vld [vmem:[#allocation2 + $0x8] sm:$0xff]  ;;  %v271_v15 = vmov 0.0  }
  0x14   :  { %v39_v2 = vsel %vm38_vm0, %v319_v0, 0.0  ;;  %v42_v3 = vsel %vm38_vm0, %v321_v1, 0.0  ;;  %v210_v14 = vld [vmem:[%s369_s3] sm:$0xff]   ;;  %196 = vmatprep.subr.bf16.mxu0 %v271_v15  ;;  %vm272_vm1 = vmmov 0   ;;  %v211_v16 = vld [vmem:[%s369_s3 + $0x8] sm:$0xff]  }
  0x15   :  { %40 = vadd.xlane.f32.xlu0 %v39_v2  ;;  %200 = vmatprep.mubr.msk.bf16.mxu0 %vm272_vm1, %v271_v15  ;;  %v187_v35 = vld [vmem:[%s367_s1] ss:$0 sm:$0xff]  ;;  %s273_s1 = smov [#allocation5]  }
  0x16   :  { %197 = vmatpush3.bf16.msra.mxu0 %v210_v14  ;;  %v188_v39 = vld [vmem:[%s368_s2] ss:$0 sm:$0xff]  ;;  %s175_s15 = sshll.u32 %s273_s1, 4  ;;  %s176_s15 = int_to_ptr.vmem [resolvable:$true] %s175_s15 }
  0x17   :  { %198 = vmatprep.subr.bf16.mxu0 %v271_v15  ;;  %v189_v44 = vld [vmem:[%s370_s4] ss:$0 sm:$0xff]  ;;  %s242_s2 = scalar_lea.vmem %s176_s15, 256  ;;  %p247_p9 = scmp.lt.s32.totalorder %s176_s15, %s176_s15 }
  0x18   :  { %p243_p8 = scmp.ne.s32.totalorder %s176_s15, %s242_s2  ;;  %p248_p10 = scmp.lt.s32.totalorder %s242_s2, %s242_s2 }
  0x19   :  { %43 = vadd.xlane.f32.xlu0 %v42_v3 }
  0x1a   :  { %199 = vmatpush3.bf16.msra.mxu0 %v211_v16  ;;  %p249_p11 = por %p248_p10, %p247_p9 }
  0x1c   :  { %p250_p12 = pnand %p249_p11, %p243_p8 }
  0xa2   :  { %v41_v4 = vpop.xlane.xlu0 %40 }
  0xa3   :  { %v46_v5 = vmul.f32 0.03125, %v41_v4 }
  0xa5   :  { %v48_v6 = vsub.f32 %v319_v0, %v46_v5 }
  0xa6   :  { %v44_v7 = vpop.xlane.xlu0 %43 }
  0xa7   :  { %v47_v8 = vmul.f32 0.03125, %v44_v7  ;;  %v50_v9 = vmul.f32 %v48_v6, %v48_v6 }
  0xa9   :  { %v49_v10 = vsub.f32 %v321_v1, %v47_v8  ;;  %v52_v11 = vsel %vm38_vm0, %v50_v9, 0.0 }
  0xaa   :  { %53 = vadd.xlane.f32.xlu1 %v52_v11 }
  0xab   :  { %v51_v12 = vmul.f32 %v49_v10, %v49_v10 }
  0xad   :  { %v55_v13 = vsel %vm38_vm0, %v51_v12, 0.0 }
  0xae   :  { %56 = vadd.xlane.f32.xlu1 %v55_v13 }
 0x137   :  { %v54_v17 = vpop.xlane.xlu1 %53 }
 0x138   :  { %v58_v18 = vmul.f32 0.032258064, %v54_v17 }
 0x13a   :  { %212 = vrsqrt.f32 %v58_v18  ;;  %vm62_vm2 = vcmp.eq.f32.partialorder %v58_v18, inf  ;;  %v65_v23 = vand.u32 2147483648, %v58_v18  ;;  %vm64_vm3 = vcmp.eq.f32.partialorder %v58_v18, 0.0 }
 0x13b   :  { %v57_v19 = vpop.xlane.xlu1 %56 }
 0x13c   :  { %v59_v20 = vmul.f32 0.032258064, %v57_v19 }
 0x13e   :  { %214 = vrsqrt.f32 %v59_v20  ;;  %vm69_vm4 = vcmp.eq.f32.partialorder %v59_v20, inf  ;;  %v72_v29 = vand.u32 2147483648, %v59_v20  ;;  %vm71_vm5 = vcmp.eq.f32.partialorder %v59_v20, 0.0 }
 0x144   :  { %v213_v21 = vpop.eup %212 }
 0x145   :  { %v61_v22 = vmul.f32 %v213_v21, %v58_v18 }
 0x147   :  { %v63_v24 = vsel %vm62_vm2, %v58_v18, %v61_v22 }
 0x148   :  { %v215_v25 = vpop.eup %214  ;;  %v66_v26 = vsel %vm64_vm3, %v65_v23, %v63_v24 }
 0x149   :  { %v74_v27 = vadd.f32 1e-06, %v66_v26  ;;  %v68_v28 = vmul.f32 %v215_v25, %v59_v20 }
 0x14b   :  { %216 = vrcp.f32 %v74_v27  ;;  %v70_v30 = vsel %vm69_vm4, %v59_v20, %v68_v28 }
 0x14c   :  { %v73_v31 = vsel %vm71_vm5, %v72_v29, %v70_v30 }
 0x14d   :  { %v75_v32 = vadd.f32 1e-06, %v73_v31 }
 0x14f   :  { %218 = vrcp.f32 %v75_v32 }
 0x155   :  { %v217_v33 = vpop.eup %216 }
 0x156   :  { %v78_v34 = vmul.f32 %v217_v33, %v48_v6 }
 0x158   :  { %v87_v38 = vmul.f32 %v187_v35, %v78_v34 }
 0x159   :  { %v219_v36 = vpop.eup %218 }
 0x15a   :  { %v79_v37 = vmul.f32 %v219_v36, %v49_v10  ;;  %v96_v41 = vadd.f32 %v188_v39, %v87_v38 }
 0x15c   :  { %v88_v40 = vmul.f32 %v187_v35, %v79_v37 }
 0x15e   :  { %v97_v42 = vadd.f32 %v188_v39, %v88_v40 }
 0x160   :  { %v98_v43 = vpack.c.bf16 %v97_v42, %v96_v41 }
 0x162   :  { %201 = vmatmul.mubr.msk.bf16.vlgmr.msra.gmra.mrb[0].mxu0 %vm38_vm0, %v98_v43 }
 0x235   :  { %v159_v45 = vpop.f32.mrb[0].mxu0 }
 0x236   :  { %v160_v46 = vadd.f32 %v189_v44, %v159_v45  ;;  %v202_v47 = vpop.f32.mrb[1].mxu0 }
 0x237   :  { %v162_v48 = vpop.f32.mrb[2].mxu0 }
 0x238   :  { %v166_v49 = vadd.f32 %v160_v46, %v319_v0  ;;  %v163_v50 = vadd.f32 %v189_v44, %v162_v48  ;;  %v203_v51 = vpop.f32.mrb[3].mxu0 }
 0x23a   :  { %168 = vst.msk [vmem:[#allocation5] sm:$0xff] %vm38_vm0, %v166_v49  ;;  %v167_v52 = vadd.f32 %v163_v50, %v321_v1 }
 0x23c   :  { %169 = vst.msk [vmem:[#allocation5 + $0x8] sm:$0xff] %vm38_vm0, %v167_v52 }
 0x23d   :  { %253 = shalt.err (!%p250_p12)
}
 0x23e   :  { %s254_s17 = scalar_lea.hbm %s371_s5, 256 }
 0x23f   :  { %p255_p13 = scmp.ne.s32.totalorder %s371_s5, %s254_s17  ;;  %p258_p0 = scmp.lt.u32.totalorder %s254_s17, %s371_s5 }
 0x241   :  { %p260_p1 = pnand %p258_p0, %p255_p13 }
 0x243   :  { %263 = shalt.err (!%p260_p1)
}
 0x244   :  { %181 = dma.vmem_to_hbm [thread:$0]  %s176_s15, 256, %s371_s5, [#allocation4], %s269_s28, %s269_s28, %s270_s29  }
 0x245   :  { %266 = dma.done.wait [#allocation4], 256  }
 0x246   :  { %267 = vsyncadd [#allocation4], 4294967040 }
 0x247   :  { %185 = vsyncpa [#allocation3], 1 }
 0x248   :  { %186 = vsyncpa [#allocation4], 1 }

</bundles_post_ra>
